<compile_context>
chip_gen: v5e
topology: v5e:2x2
jax: 0.10.0
libtpu: 0.0.40
codegen_flags: <defaults>
</compile_context>

<pallas_src>
import functools

import jax
import jax.numpy as jnp
from jax.experimental import pallas as pl
from jax.experimental.pallas import tpu as pltpu

_LANE = 128       # vreg lane width
_SUBLANE = 8      # vreg sublane count
_NEG = -1e30      # large-negative bias for padded logit lanes (exp underflows to 0)


def _categorical_kernel(x_ref, w_ref, b_ref, logits_ref, probs_ref):
    # Linear: z = x @ W_t + b   (W_t pre-transposed / lane-padded to [in, Npad]).
    z = jnp.dot(x_ref[...], w_ref[...], preferred_element_type=jnp.float32)
    z = z + b_ref[...]                       # (1, Npad) broadcasts over batch tile

    # Padded lanes carry bias = -1e30 -> exp underflows to exactly 0, so the
    # softmax reduction over the full 128-lane vreg matches the unpadded math.
    m = jnp.max(z, axis=-1, keepdims=True)
    e = jnp.exp(z - m)
    s = jnp.sum(e, axis=-1, keepdims=True)
    lse = m + jnp.log(s)

    # EUP reciprocal + one Newton step: ~f32 accuracy, frees VPU slots.
    inv = pl.reciprocal(s, approx=True)
    inv = inv * (2.0 - s * inv)

    logits_ref[...] = (z - lse).astype(logits_ref.dtype)   # normalized log-probs
    probs_ref[...] = (e * inv).astype(probs_ref.dtype)


def _round_up(x, m):
    return (x + m - 1) // m * m


@functools.partial(jax.jit, static_argnames=("block_b",))
def _categorical_padded(x_pad, w_pad, b_pad, *, block_b):
    Bpad, D = x_pad.shape
    _, Npad = w_pad.shape
    grid = (Bpad // block_b,)

    cost = pl.CostEstimate(
        flops=2 * Bpad * D * Npad,
        transcendentals=Bpad * (Npad + 2),
        bytes_accessed=4 * (Bpad * D + D * Npad + Npad + 2 * Bpad * Npad),
    )

    grid_spec = pltpu.PrefetchScalarGridSpec(
        num_scalar_prefetch=0,
        grid=grid,
        in_specs=[
            pl.BlockSpec((block_b, D), lambda i: (i, 0)),   # x tile marches over batch
            pl.BlockSpec((D, Npad), lambda i: (0, 0)),      # weights resident
            pl.BlockSpec((1, Npad), lambda i: (0, 0)),      # bias resident (lane-dense)
        ],
        out_specs=[
            pl.BlockSpec((block_b, Npad), lambda i: (i, 0)),
            pl.BlockSpec((block_b, Npad), lambda i: (i, 0)),
        ],
    )

    return pl.pallas_call(
        _categorical_kernel,
        out_shape=(
            jax.ShapeDtypeStruct((Bpad, Npad), jnp.float32),
            jax.ShapeDtypeStruct((Bpad, Npad), jnp.float32),
        ),
        grid_spec=grid_spec,
        compiler_params=pltpu.CompilerParams(
            dimension_semantics=("parallel",)),   # independent batch tiles -> megacore
        cost_estimate=cost,
    )(x_pad, w_pad, b_pad)


def categorical_forward(x, w_t, b, *, block_b=512):
    """x: [B, num_inputs], w_t: [num_inputs, num_outputs], b: [1, num_outputs].

    Returns (normalized_logits, probs), each [B, num_outputs] float32.
    """
    B, D = x.shape
    _, N = w_t.shape

    # Lane-pad the output feature axis to a multiple of 128.
    Npad = _round_up(max(N, _LANE), _LANE)
    # Batch tile: multiple of 8 sublanes, capped at block_b, cover full batch.
    tb = _round_up(min(block_b, _round_up(B, _SUBLANE)), _SUBLANE)
    Bpad = _round_up(B, tb)

    x_pad = jnp.pad(x, ((0, Bpad - B), (0, 0)))
    w_pad = jnp.pad(w_t, ((0, 0), (0, Npad - N)))
    # Padded bias lanes at a huge negative value -> zero probability mass.
    b_pad = jnp.pad(b, ((0, 0), (0, Npad - N)), constant_values=_NEG)

    logits_p, probs_p = _categorical_padded(x_pad, w_pad, b_pad, block_b=tb)
    return logits_p[:B, :N], probs_p[:B, :N]


def orthogonal_init(key, shape, gain):
    """Deterministic equivalent of nn.init.orthogonal_ for a 2-D weight."""
    rows, cols = shape
    a = jax.random.normal(key, (rows, cols), dtype=jnp.float32)
    flat = a if rows >= cols else a.T
    q, r = jnp.linalg.qr(flat)
    d = jnp.sign(jnp.diagonal(r))
    q = q * d[None, :]
    if rows < cols:
        q = q.T
    return gain * q


def reference_forward(x, w_t, b):
    z = x @ w_t + b
    lse = jax.scipy.special.logsumexp(z, axis=-1, keepdims=True)
    return z - lse, jax.nn.softmax(z, axis=-1)


if __name__ == "__main__":
    # Shapes implied by the module: num_inputs (hidden) = 32,
    # num_outputs (action dim) = 16.
    NUM_INPUTS, NUM_OUTPUTS = 32, 16

    key = jax.random.PRNGKey(0)
    k_w, k_x1, k_x2 = jax.random.split(key, 3)

    # nn.Linear weight is [num_outputs, num_inputs]; orthogonal init, gain=0.01.
    w = orthogonal_init(k_w, (NUM_OUTPUTS, NUM_INPUTS), gain=0.01)
    b = jnp.zeros((1, NUM_OUTPUTS), dtype=jnp.float32)     # constant_(0)
    w_t = jnp.asarray(w.T, dtype=jnp.float32)               # [in, out] for the kernel

    # --- small batch (matches the module's toy usage) ---
    B1 = 8
    x1 = jax.random.normal(k_x1, (B1, NUM_INPUTS), dtype=jnp.float32)
    logits1, probs1 = categorical_forward(x1, w_t, b)
    jax.block_until_ready((logits1, probs1))
    ref_l1, ref_p1 = reference_forward(x1, w_t, b)
    assert logits1.shape == (B1, NUM_OUTPUTS) and probs1.shape == (B1, NUM_OUTPUTS)
    assert jnp.allclose(logits1, ref_l1, atol=1e-5, rtol=1e-5)
    assert jnp.allclose(probs1, ref_p1, atol=1e-5, rtol=1e-5)
    assert jnp.allclose(jnp.sum(probs1, axis=-1), 1.0, atol=1e-5)

    # --- larger, non-multiple-of-8 batch (exercises batch tiling + padding) ---
    B2 = 1000
    x2 = jax.random.normal(k_x2, (B2, NUM_INPUTS), dtype=jnp.float32)
    logits2, probs2 = categorical_forward(x2, w_t, b, block_b=512)
    jax.block_until_ready((logits2, probs2))
    ref_l2, ref_p2 = reference_forward(x2, w_t, b)
    assert logits2.shape == (B2, NUM_OUTPUTS) and probs2.shape == (B2, NUM_OUTPUTS)
    assert jnp.allclose(logits2, ref_l2, atol=1e-5, rtol=1e-5)
    assert jnp.allclose(probs2, ref_p2, atol=1e-5, rtol=1e-5)
    assert jnp.allclose(jnp.sum(probs2, axis=-1), 1.0, atol=1e-5)

    print("KERNEL_OK")
</pallas_src>

<mosaic_0001>
module attributes {stable_mosaic.version = 11 : i64} {
  func.func @_categorical_kernel(%arg0: i32, %arg1: memref<8x32xf32, #tpu.memory_space<vmem>>, %arg2: memref<32x128xf32, #tpu.memory_space<vmem>>, %arg3: memref<1x128xf32, #tpu.memory_space<vmem>>, %arg4: memref<8x128xf32, #tpu.memory_space<vmem>>, %arg5: memref<8x128xf32, #tpu.memory_space<vmem>>) attributes {dimension_semantics = [#tpu.dimension_semantics<parallel>], iteration_bounds = array<i64: 1>, scalar_prefetch = 0 : i64, scratch_operands = 0 : i64, tpu.core_type = #tpu.core_type<tc>, window_params = [{transform_indices = @transform_0, window_bounds = array<i64: 8, 32>}, {pipeline_mode = #tpu.pipeline_mode<synchronous>, transform_indices = @transform_1, window_bounds = array<i64: 32, 128>}, {pipeline_mode = #tpu.pipeline_mode<synchronous>, transform_indices = @transform_2, window_bounds = array<i64: 1, 128>}, {transform_indices = @transform_3, window_bounds = array<i64: 8, 128>}, {transform_indices = @transform_4, window_bounds = array<i64: 8, 128>}]} {
    %c0 = arith.constant 0 : index
    %c0_0 = arith.constant 0 : index
    %0 = vector.load %arg1[%c0, %c0_0] : memref<8x32xf32, #tpu.memory_space<vmem>>, vector<8x32xf32>
    %c0_1 = arith.constant 0 : index
    %c0_2 = arith.constant 0 : index
    %1 = vector.load %arg2[%c0_1, %c0_2] : memref<32x128xf32, #tpu.memory_space<vmem>>, vector<32x128xf32>
    %cst = arith.constant dense<0.000000e+00> : vector<8x128xf32>
    %2 = tpu.matmul %0, %1, %cst {dimension_numbers = #tpu.dot_dimension_numbers<[1], [0], [0], [1], [0, 0, 1, 1], [], []>} : vector<8x32xf32>, vector<32x128xf32>, vector<8x128xf32> -> vector<8x128xf32>
    %c0_3 = arith.constant 0 : index
    %c0_4 = arith.constant 0 : index
    %3 = vector.load %arg3[%c0_3, %c0_4] : memref<1x128xf32, #tpu.memory_space<vmem>>, vector<1x128xf32>
    %4 = vector.broadcast %3 : vector<1x128xf32> to vector<8x128xf32>
    %5 = arith.addf %2, %4 : vector<8x128xf32>
    %cst_5 = arith.constant dense<0xFF800000> : vector<8xf32>
    %6 = vector.multi_reduction <maximumf>, %5, %cst_5 [1] : vector<8x128xf32> to vector<8xf32>
    %7 = vector.shape_cast %6 : vector<8xf32> to vector<8x1xf32>
    %8 = vector.broadcast %7 : vector<8x1xf32> to vector<8x128xf32>
    %9 = arith.subf %5, %8 : vector<8x128xf32>
    %10 = math.exp %9 : vector<8x128xf32>
    %cst_6 = arith.constant dense<0.000000e+00> : vector<8xf32>
    %11 = vector.multi_reduction <add>, %10, %cst_6 [1] : vector<8x128xf32> to vector<8xf32>
    %12 = vector.shape_cast %11 : vector<8xf32> to vector<8x1xf32>
    %13 = math.log %12 : vector<8x1xf32>
    %14 = arith.addf %7, %13 : vector<8x1xf32>
    %15 = tpu.reciprocal %12 {approx = true} : vector<8x1xf32> -> vector<8x1xf32>
    %16 = arith.mulf %12, %15 : vector<8x1xf32>
    %cst_7 = arith.constant 2.000000e+00 : f32
    %17 = vector.broadcast %cst_7 : f32 to vector<8x1xf32>
    %18 = arith.subf %17, %16 : vector<8x1xf32>
    %19 = arith.mulf %15, %18 : vector<8x1xf32>
    %20 = vector.broadcast %14 : vector<8x1xf32> to vector<8x128xf32>
    %21 = arith.subf %5, %20 : vector<8x128xf32>
    %c0_8 = arith.constant 0 : index
    %c0_9 = arith.constant 0 : index
    %22 = vector.load %arg4[%c0_8, %c0_9] : memref<8x128xf32, #tpu.memory_space<vmem>>, vector<8x128xf32>
    tpu.vector_store %arg4[%c0_8, %c0_9], %21 {strides = array<i32>} : memref<8x128xf32, #tpu.memory_space<vmem>>, vector<8x128xf32>,
    %23 = vector.broadcast %19 : vector<8x1xf32> to vector<8x128xf32>
    %24 = arith.mulf %10, %23 : vector<8x128xf32>
    %c0_10 = arith.constant 0 : index
    %c0_11 = arith.constant 0 : index
    %25 = vector.load %arg5[%c0_10, %c0_11] : memref<8x128xf32, #tpu.memory_space<vmem>>, vector<8x128xf32>
    tpu.vector_store %arg5[%c0_10, %c0_11], %24 {strides = array<i32>} : memref<8x128xf32, #tpu.memory_space<vmem>>, vector<8x128xf32>,
    return
  }
  func.func @transform_0(%arg0: i32) -> (i32, i32) {
    %c0_i32 = arith.constant 0 : i32
    %c0_i32_0 = arith.constant 0 : i32
    return %arg0, %c0_i32 : i32, i32
  }
  func.func @transform_1(%arg0: i32) -> (i32, i32) {
    %c0_i32 = arith.constant 0 : i32
    %c0_i32_0 = arith.constant 0 : i32
    %c0_i32_1 = arith.constant 0 : i32
    return %c0_i32, %c0_i32_0 : i32, i32
  }
  func.func @transform_2(%arg0: i32) -> (i32, i32) {
    %c0_i32 = arith.constant 0 : i32
    %c0_i32_0 = arith.constant 0 : i32
    %c0_i32_1 = arith.constant 0 : i32
    return %c0_i32, %c0_i32_0 : i32, i32
  }
  func.func @transform_3(%arg0: i32) -> (i32, i32) {
    %c0_i32 = arith.constant 0 : i32
    %c0_i32_0 = arith.constant 0 : i32
    return %arg0, %c0_i32 : i32, i32
  }
  func.func @transform_4(%arg0: i32) -> (i32, i32) {
    %c0_i32 = arith.constant 0 : i32
    %c0_i32_0 = arith.constant 0 : i32
    return %arg0, %c0_i32 : i32, i32
  }
}

</mosaic_0001>

<bundles_post_ra>
// kernel: _categorical_padded.1
= control target key start
LH: loop header
LB: loop body
LE: loop exit
PB: predicated region body
PF: predicated region fallthrough
CT: control target
= control target key end

     0   :  { %10 = vsyncpa [#allocation3], 0  ;;  %s297_s0 = inlined_call_operand.hbm [shape: f32[8,32], index: 0, kind: input, shape index: {}]   ;;  %s298_s1 = inlined_call_operand.hbm [shape: f32[32,128], index: 1, kind: input, shape index: {}]   ;;  %s299_s2 = inlined_call_operand.vmem [shape: f32[1,128], index: 2, kind: input, shape index: {}]   ;;  %s300_s3 = inlined_call_operand.hbm [shape: f32[8,128], index: 3, kind: output, shape index: {0}]   ;;  %s301_s4 = inlined_call_operand.hbm [shape: f32[8,128], index: 4, kind: output, shape index: {1}]  }
   0x1   :  { %11 = vsyncpa [#allocation6], 0 }
   0x2   :  { %12 = vsyncpa [#allocation4], 0 }
   0x3   :  { %13 = vsyncpa [#allocation9], 0  ;;  %s19_s17 = sshll.u32 %s297_s0, 4  ;;  %s251_s18 = smov [#allocation2]   ;;  %s20_s17 = int_to_ptr.hbm [resolvable:$true] %s19_s17 }
   0x4   :  { %s21_s19 = sshll.u32 %s251_s18, 4  ;;  %s29_s22 = sshll.u32 %s298_s1, 4  ;;  %s22_s19 = int_to_ptr.vmem [resolvable:$true] %s21_s19  ;;  %s30_s22 = int_to_ptr.hbm [resolvable:$true] %s29_s22 }
   0x5   :  { %24 = dma.hbm_to_vmem [thread:$0]  %s20_s17, 128, %s22_s19, [#allocation3]  }
   0x6   :  { %s252_s23 = smov [#allocation5]   ;;  %s253_s25 = smov 128  }
   0x7   :  { %s31_s24 = sshll.u32 %s252_s23, 4  ;;  %s254_s26 = smov 8   ;;  %s32_s24 = int_to_ptr.vmem [resolvable:$true] %s31_s24 }
   0x8   :  { %37 = dma.hbm_to_vmem [thread:$0]  %s30_s22, 512, %s32_s24, [#allocation6], %s253_s25, %s253_s25, %s254_s26  }
   0x9   :  { %243 = dma.done.wait [#allocation3], 128  }
   0xa   :  { %244 = vsyncadd [#allocation3], 4294967168 }
   0xb   :  { %245 = dma.done.wait [#allocation6], 512  }
   0xc   :  { %246 = vsyncadd [#allocation6], 4294966784  ;;  %v52_v0 = vld [vmem:[#allocation5 + $0x18] sm:$0xff]  ;;  %v51_v1 = vld [vmem:[#allocation5 + $0x10] sm:$0xff]  ;;  %vm57_vm0 = vcmask 261120   ;;  %s255_s27 = smov [#allocation7]  }
   0xd   :  { %73 = vmatpush.msra.mxu0 %v52_v0  ;;  %v50_v2 = vld [vmem:[#allocation5 + $0x8] sm:$0xff]  ;;  %v49_v3 = vld [vmem:[#allocation5] sm:$0xff]  ;;  %v48_v4 = vld [vmem:[#allocation2] sm:$0xff]  ;;  %s104_s28 = sshll.u32 %s255_s27, 4  ;;  %s106_s30 = sshll.u32 %s300_s3, 4  ;;  %s105_s28 = int_to_ptr.vmem [resolvable:$true] %s104_s28  ;;  %s107_s30 = int_to_ptr.hbm [resolvable:$true] %s106_s30 }
   0xe   :  { %v140_v5 = vld [vmem:[%s299_s2] ss:$0 sm:$0xff]  ;;  %s256_s5 = smov [#allocation8]   ;;  %s117_s9 = sshll.u32 %s301_s4, 4  ;;  %s118_s9 = int_to_ptr.hbm [resolvable:$true] %s117_s9 }
   0xf   :  { %74 = vmatpush.msra.mxu0 %v51_v1  ;;  %s115_s6 = sshll.u32 %s256_s5, 4  ;;  %s116_s6 = int_to_ptr.vmem [resolvable:$true] %s115_s6 }
  0x11   :  { %75 = vmatpush.msra.mxu0 %v50_v2 }
  0x13   :  { %76 = vmatpush.msra.mxu0 %v49_v3 }
  0x14   :  { %133 = vmatmul.msk.f32.vlgmr.msra.gmra.mxu0 %vm57_vm0, %v48_v4 }
  0x91   :  { %v78_v6 = vpop.f32.mrf.mxu0 }
  0x92   :  { %v79_v7 = vadd.f32 %v140_v5, %v78_v6 }
  0x94   :  { %81 = vmax.xlane.f32.xlu0 %v79_v7 }
 0x107   :  { %v82_v8 = vpop.xlane.xlu0 %81 }
 0x108   :  { %v83_v9 = vsub.f32 %v79_v7, %v82_v8 }
 0x10a   :  { %v84_v10 = vmul.f32 1.442695, %v83_v9 }
 0x10c   :  { %141 = vpow2.f32 %v84_v10 }
 0x112   :  { %v142_v11 = vpop.eup %141 }
 0x113   :  { %86 = vadd.xlane.f32.xlu0 %v142_v11 }
 0x186   :  { %v87_v12 = vpop.xlane.xlu0 %86 }
 0x187   :  { %143 = vlog2.f32 %v87_v12 }
 0x188   :  { %145 = vrcp.f32 %v87_v12 }
 0x18d   :  { %v144_v13 = vpop.eup %143 }
 0x18e   :  { %v146_v14 = vpop.eup %145  ;;  %v89_v15 = vmul.f32 0.6931472, %v144_v13 }
 0x18f   :  { %v92_v16 = vmul.f32 %v146_v14, %v87_v12 }
 0x190   :  { %v90_v17 = vadd.f32 %v89_v15, %v82_v8 }
 0x191   :  { %v93_v18 = vsub.f32 2.0, %v92_v16 }
 0x192   :  { %v95_v19 = vsub.f32 %v79_v7, %v90_v17 }
 0x193   :  { %v94_v20 = vmul.f32 %v146_v14, %v93_v18 }
 0x194   :  { %96 = vst [vmem:[#allocation7] sm:$0xff] %v95_v19 }
 0x195   :  { %109 = dma.vmem_to_hbm [thread:$0]  %s105_s28, 128, %s107_s30, [#allocation4]   ;;  %v97_v21 = vmul.f32 %v142_v11, %v94_v20 }
 0x197   :  { %98 = vst [vmem:[#allocation8] sm:$0xff] %v97_v21 }
 0x198   :  { %120 = dma.vmem_to_hbm [thread:$0]  %s116_s6, 128, %s118_s9, [#allocation9]  }
 0x199   :  { %247 = dma.done.wait [#allocation4], 128  }
 0x19a   :  { %248 = vsyncadd [#allocation4], 4294967168 }
 0x19b   :  { %249 = dma.done.wait [#allocation9], 128  }
 0x19c   :  { %250 = vsyncadd [#allocation9], 4294967168 }
 0x19d   :  { %129 = vsyncpa [#allocation3], 1 }
 0x19e   :  { %130 = vsyncpa [#allocation6], 1 }
 0x19f   :  { %131 = vsyncpa [#allocation4], 1 }
 0x1a0   :  { %132 = vsyncpa [#allocation9], 1 }

</bundles_post_ra>
